<compile_context>
chip_gen: v5e
topology: v5e:2x2
jax: 0.10.0
libtpu: 0.0.40
codegen_flags: <defaults>
</compile_context>

<pallas_src>
import math

import jax
import jax.numpy as jnp
import numpy as np
from jax.experimental import pallas as pl
from jax.experimental.pallas import tpu as pltpu


def _round_up(x: int, m: int) -> int:
    return ((x + m - 1) // m) * m


def _cdiv(a: int, b: int) -> int:
    return (a + b - 1) // b


def _fuse_mlp_kernel(tok_ref, pb_ref, w0t_ref, w1_ref, b1_ref, w2_ref, b2_ref,
                     o_ref):
    # tok_ref: (1, ts, E) compute dtype; pb_ref: (ts, 2E) compute dtype
    #   (batch-invariant pe[:S] @ W0_pos + b0; fetched once per seq tile).
    # Weights/biases are whole-array resident VMEM refs (untiled).
    tok = tok_ref[0]                                               # (ts, E)
    h = jnp.dot(tok, w0t_ref[...],
                preferred_element_type=jnp.float32)                # (ts, 2E) f32
    h = jnp.maximum(h + pb_ref[...].astype(jnp.float32), 0.0)
    h = jnp.dot(h.astype(w1_ref.dtype), w1_ref[...],
                preferred_element_type=jnp.float32)                # (ts, 4E) f32
    h = jnp.maximum(h + b1_ref[...], 0.0)
    out = jnp.dot(h.astype(w2_ref.dtype), w2_ref[...],
                  preferred_element_type=jnp.float32)              # (ts, E) f32
    # TODO(synk): for E < 128 this store is lane-masked (vst.msk); a lane-dense
    # variant would relayout (ts, E) -> (ts // (128//E), (128//E)*E) before the
    # store (or production configs should keep E a multiple of 128).
    o_ref[0] = (out + b2_ref[...]).astype(o_ref.dtype)


def sine_cosine_pe_table(block_size: int, embedding_dim: int) -> jnp.ndarray:
    """Buffer computed in __init__ (plain-JAX glue, not the hot path)."""
    position = jnp.arange(block_size, dtype=jnp.float32)[:, None]          # (S, 1)
    div_term = jnp.exp(jnp.arange(0, embedding_dim, 2, dtype=jnp.float32)
                       * (-math.log(10000.0) / embedding_dim))             # (E/2,)
    sin = jnp.sin(position * div_term)
    cos = jnp.cos(position * div_term)
    pe = jnp.stack([sin, cos], axis=-1).reshape(block_size, embedding_dim)
    return pe


def _vmem_ceiling_bytes() -> int:
    """Physical VMEM minus headroom; conservative fallback if query fails."""
    cap = 64 << 20
    try:
        cap = int(getattr(pltpu.get_tpu_info(), "vmem_capacity_bytes", cap))
    except Exception:
        pass
    return max(cap - (16 << 20), 32 << 20)


def sine_cosine_position_encoding(tok_emb, pe, params, *, row_tile=None,
                                  compute_dtype=jnp.bfloat16,
                                  token_buffers=2):
    """tok_emb: (B, S, E); pe: (block_size, E); returns (B, S, E) in tok dtype.

    Note: operands (incl. the folded position bias) are cast to compute_dtype
    (bf16 by default) while all matmul accumulation stays f32 — intentional
    rounding vs a pure-f32 reference.
    """
    B, S, E = tok_emb.shape
    assert S <= pe.shape[0], "sequence length exceeds position table"
    w0, b0, w1, b1, w2, b2 = params
    out_dtype = tok_emb.dtype
    isz = jnp.dtype(compute_dtype).itemsize
    osz = jnp.dtype(out_dtype).itemsize
    sub = 8 if isz == 4 else 16                 # sublane multiple per dtype

    # Split the first layer: rows [0:E] of W0 act on the position half of the
    # concat, rows [E:2E] on the token half.  Fold the batch-invariant position
    # part into a per-seq-row bias (computed once in f32, stored compute_dtype).
    w0_pos, w0_tok = w0[:E], w0[E:]
    pos_bias = (pe[:S].astype(jnp.float32) @ w0_pos.astype(jnp.float32)
                + b0.astype(jnp.float32)).astype(compute_dtype)      # (S, 2E)

    w0_tok_c = w0_tok.astype(compute_dtype)
    w1_c = w1.astype(compute_dtype)
    w2_c = w2.astype(compute_dtype)
    b1_f = b1.astype(jnp.float32)
    b2_f = b2.astype(jnp.float32)

    # Single-buffered resident weights + double-buffered activation tiles.
    weight_bytes = ((w0_tok_c.size + w1_c.size + w2_c.size) * isz
                    + (b1_f.size + b2_f.size) * 4)
    ceiling = _vmem_ceiling_bytes()

    # --- sequence-tile selection -------------------------------------------
    if row_tile is not None:
        assert row_tile % sub == 0, f"row_tile must be a multiple of {sub}"
    target = row_tile or 1024
    ts = min(_round_up(S, sub), _round_up(target, sub))

    def vmem_needed(ts_: int) -> int:
        act = (token_buffers * ts_ * E * isz       # token tiles
               + 2 * ts_ * 2 * E * isz             # pos-bias tile (double buf)
               + 2 * ts_ * E * osz                 # output tile (double buf)
               + ts_ * 7 * E * 4)                  # f32 intermediates (2E+4E+E)
        return int(weight_bytes + act)

    while ts > sub and vmem_needed(ts) > ceiling:
        ts = _round_up(ts // 2, sub)
    # TODO(synk): if resident bf16 weights alone exceed the ceiling (E >~ 1k on
    # v7x's 64 MiB VMEM), switch W1/W2 to blocked specs with a K-reduction grid
    # axis (accumulator + pl.when init/finalize) instead of shrinking tiles.

    # Guarantee >= 2 grid steps when possible so both v7x TensorCores get work.
    if B * _cdiv(S, ts) < 2 and S > sub:
        ts = _round_up(_cdiv(S, 2), sub)

    S_pad = _round_up(S, ts)
    # TODO(synk): when S is very small and B very large, fold several batch
    # rows per tile to keep MXU matmuls tall (not needed for typical configs).

    tok3 = tok_emb.astype(compute_dtype)
    pb = pos_bias
    if S_pad != S:
        tok3 = jnp.pad(tok3, ((0, 0), (0, S_pad - S), (0, 0)))
        pb = jnp.pad(pb, ((0, S_pad - S), (0, 0)))

    # Grid: seq tiles outer, batch inner.  The pos-bias block index depends
    # only on the seq axis, so it is revisited (NOT re-DMA'd) across batch.
    grid = (S_pad // ts, B)

    def resident_vmem():
        # Untiled, whole-array VMEM residency: loaded once, not double-buffered.
        return pl.BlockSpec(memory_space=pltpu.MemorySpace.VMEM)

    tok_spec_kwargs = {}
    if token_buffers != 2:
        # Deeper pipelining for small-E configs where per-tile compute is tiny
        # and DMA would otherwise be exposed.
        tok_spec_kwargs["pipeline_mode"] = pl.Buffered(token_buffers)
    tok_spec = pl.BlockSpec((1, ts, E), lambda j, b: (b, j, 0),
                            **tok_spec_kwargs)

    vmem_limit = int(min(ceiling, max(vmem_needed(ts) + (8 << 20), 32 << 20)))

    flops = int(2 * B * S_pad * (E * 2 * E + 2 * E * 4 * E + 4 * E * E))
    bytes_accessed = int(B * S_pad * E * (isz + osz)       # tok in + out
                         + S_pad * 2 * E * isz             # pos bias (once)
                         + weight_bytes)

    out3 = pl.pallas_call(
        _fuse_mlp_kernel,
        out_shape=jax.ShapeDtypeStruct((B, S_pad, E), out_dtype),
        grid_spec=pltpu.PrefetchScalarGridSpec(
            num_scalar_prefetch=0,
            grid=grid,
            in_specs=[
                tok_spec,                                        # token rows
                pl.BlockSpec((ts, 2 * E), lambda j, b: (j, 0)),  # pos bias rows
                resident_vmem(),   # w0_tok
                resident_vmem(),   # w1
                resident_vmem(),   # b1
                resident_vmem(),   # w2
                resident_vmem(),   # b2
            ],
            out_specs=pl.BlockSpec((1, ts, E), lambda j, b: (b, j, 0)),
        ),
        compiler_params=pltpu.CompilerParams(
            dimension_semantics=("parallel", "parallel"),
            vmem_limit_bytes=vmem_limit),
        cost_estimate=pl.CostEstimate(flops=flops, transcendentals=0,
                                      bytes_accessed=bytes_accessed),
    )(tok3, pb, w0_tok_c, w1_c, b1_f, w2_c, b2_f)

    return out3[:, :S]


def init_fuse_mlp_params(key, embedding_dim: int, mlp_layer_factors=(2, 4, 1)):
    """Deterministic synthetic init for the fuse MLP.  Weights stored as
    (in, out) so the kernel computes x @ W + b (== nn.Linear's x @ W.T + b)."""
    params = []
    in_factor = 2
    for out_factor in mlp_layer_factors:
        d_in = in_factor * embedding_dim
        d_out = out_factor * embedding_dim
        key, kw, kb = jax.random.split(key, 3)
        bound = 1.0 / math.sqrt(d_in)
        w = jax.random.uniform(kw, (d_in, d_out), jnp.float32, -bound, bound)
        b = jax.random.uniform(kb, (1, d_out), jnp.float32, -bound, bound)
        params += [w, b]
        in_factor = out_factor
    return tuple(params)


def _reference(tok_emb, pe, params):
    w0, b0, w1, b1, w2, b2 = params
    B, S, E = tok_emb.shape
    pos = jnp.broadcast_to(pe[:S][None], (B, S, E))
    x = jnp.concatenate([pos, tok_emb], axis=-1)
    h = jax.nn.relu(x @ w0 + b0)
    h = jax.nn.relu(h @ w1 + b1)
    return h @ w2 + b2


if __name__ == "__main__":
    key = jax.random.PRNGKey(0)
    B, S, E = 2, 8, 32
    block_size = 16  # pe table longer than seq, sliced to S in forward

    k_tok, k_params = jax.random.split(key)
    tok_emb = jax.random.normal(k_tok, (B, S, E), jnp.float32)
    pe = sine_cosine_pe_table(block_size, E)
    params = init_fuse_mlp_params(k_params, E)

    ref = _reference(tok_emb, pe, params)

    # Exact-path check (f32 operands, f32 accumulation).
    out_f32 = jax.block_until_ready(
        sine_cosine_position_encoding(tok_emb, pe, params,
                                      compute_dtype=jnp.float32))
    np.testing.assert_allclose(np.asarray(out_f32), np.asarray(ref),
                               rtol=1e-3, atol=1e-3)

    # Default fast path: bf16 operands on the MXU, f32 accumulation.
    out_bf16 = jax.block_until_ready(
        sine_cosine_position_encoding(tok_emb, pe, params))
    np.testing.assert_allclose(np.asarray(out_bf16), np.asarray(ref),
                               rtol=5e-2, atol=3e-2)

    print("KERNEL_OK")
</pallas_src>

<mosaic_0001>
module attributes {stable_mosaic.version = 11 : i64} {
  func.func @_fuse_mlp_kernel(%arg0: i32, %arg1: i32, %arg2: memref<1x8x32xf32, #tpu.memory_space<vmem>>, %arg3: memref<8x64xf32, #tpu.memory_space<vmem>>, %arg4: memref<32x64xf32, #tpu.memory_space<vmem>>, %arg5: memref<64x128xf32, #tpu.memory_space<vmem>>, %arg6: memref<1x128xf32, #tpu.memory_space<vmem>>, %arg7: memref<128x32xf32, #tpu.memory_space<vmem>>, %arg8: memref<1x32xf32, #tpu.memory_space<vmem>>, %arg9: memref<1x8x32xf32, #tpu.memory_space<vmem>>) attributes {dimension_semantics = [#tpu.dimension_semantics<parallel>, #tpu.dimension_semantics<parallel>], iteration_bounds = array<i64: 1, 2>, scalar_prefetch = 0 : i64, scratch_operands = 0 : i64, tpu.core_type = #tpu.core_type<tc>, window_params = [{transform_indices = @transform_0, window_bounds = array<i64: 1, 8, 32>}, {transform_indices = @transform_1, window_bounds = array<i64: 8, 64>}, {pipeline_mode = #tpu.pipeline_mode<synchronous>, transform_indices = @transform_2, window_bounds = array<i64: 32, 64>}, {pipeline_mode = #tpu.pipeline_mode<synchronous>, transform_indices = @transform_3, window_bounds = array<i64: 64, 128>}, {pipeline_mode = #tpu.pipeline_mode<synchronous>, transform_indices = @transform_4, window_bounds = array<i64: 1, 128>}, {pipeline_mode = #tpu.pipeline_mode<synchronous>, transform_indices = @transform_5, window_bounds = array<i64: 128, 32>}, {pipeline_mode = #tpu.pipeline_mode<synchronous>, transform_indices = @transform_6, window_bounds = array<i64: 1, 32>}, {transform_indices = @transform_7, window_bounds = array<i64: 1, 8, 32>}]} {
    %c0 = arith.constant 0 : index
    %c0_0 = arith.constant 0 : index
    %c0_1 = arith.constant 0 : index
    %0 = vector.load %arg2[%c0, %c0_0, %c0_1] : memref<1x8x32xf32, #tpu.memory_space<vmem>>, vector<1x8x32xf32>
    %1 = vector.shape_cast %0 : vector<1x8x32xf32> to vector<8x32xf32>
    %c0_2 = arith.constant 0 : index
    %c0_3 = arith.constant 0 : index
    %2 = vector.load %arg4[%c0_2, %c0_3] : memref<32x64xf32, #tpu.memory_space<vmem>>, vector<32x64xf32>
    %cst = arith.constant dense<0.000000e+00> : vector<8x64xf32>
    %3 = tpu.matmul %1, %2, %cst {dimension_numbers = #tpu.dot_dimension_numbers<[1], [0], [0], [1], [0, 0, 1, 1], [], []>} : vector<8x32xf32>, vector<32x64xf32>, vector<8x64xf32> -> vector<8x64xf32>
    %c0_4 = arith.constant 0 : index
    %c0_5 = arith.constant 0 : index
    %4 = vector.load %arg3[%c0_4, %c0_5] : memref<8x64xf32, #tpu.memory_space<vmem>>, vector<8x64xf32>
    %5 = arith.addf %3, %4 : vector<8x64xf32>
    %cst_6 = arith.constant 0.000000e+00 : f32
    %6 = vector.broadcast %cst_6 : f32 to vector<8x64xf32>
    %7 = arith.maximumf %5, %6 : vector<8x64xf32>
    %c0_7 = arith.constant 0 : index
    %c0_8 = arith.constant 0 : index
    %8 = vector.load %arg5[%c0_7, %c0_8] : memref<64x128xf32, #tpu.memory_space<vmem>>, vector<64x128xf32>
    %cst_9 = arith.constant dense<0.000000e+00> : vector<8x128xf32>
    %9 = tpu.matmul %7, %8, %cst_9 {dimension_numbers = #tpu.dot_dimension_numbers<[1], [0], [0], [1], [0, 0, 1, 1], [], []>} : vector<8x64xf32>, vector<64x128xf32>, vector<8x128xf32> -> vector<8x128xf32>
    %c0_10 = arith.constant 0 : index
    %c0_11 = arith.constant 0 : index
    %10 = vector.load %arg6[%c0_10, %c0_11] : memref<1x128xf32, #tpu.memory_space<vmem>>, vector<1x128xf32>
    %11 = vector.broadcast %10 : vector<1x128xf32> to vector<8x128xf32>
    %12 = arith.addf %9, %11 : vector<8x128xf32>
    %cst_12 = arith.constant 0.000000e+00 : f32
    %13 = vector.broadcast %cst_12 : f32 to vector<8x128xf32>
    %14 = arith.maximumf %12, %13 : vector<8x128xf32>
    %c0_13 = arith.constant 0 : index
    %c0_14 = arith.constant 0 : index
    %15 = vector.load %arg7[%c0_13, %c0_14] : memref<128x32xf32, #tpu.memory_space<vmem>>, vector<128x32xf32>
    %cst_15 = arith.constant dense<0.000000e+00> : vector<8x32xf32>
    %16 = tpu.matmul %14, %15, %cst_15 {dimension_numbers = #tpu.dot_dimension_numbers<[1], [0], [0], [1], [0, 0, 1, 1], [], []>} : vector<8x128xf32>, vector<128x32xf32>, vector<8x32xf32> -> vector<8x32xf32>
    %c0_16 = arith.constant 0 : index
    %c0_17 = arith.constant 0 : index
    %17 = vector.load %arg8[%c0_16, %c0_17] : memref<1x32xf32, #tpu.memory_space<vmem>>, vector<1x32xf32>
    %18 = vector.broadcast %17 : vector<1x32xf32> to vector<8x32xf32>
    %19 = arith.addf %16, %18 : vector<8x32xf32>
    %c0_18 = arith.constant 0 : index
    %c0_19 = arith.constant 0 : index
    %c0_20 = arith.constant 0 : index
    %20 = vector.load %arg9[%c0_18, %c0_19, %c0_20] : memref<1x8x32xf32, #tpu.memory_space<vmem>>, vector<1x8x32xf32>
    %21 = vector.shape_cast %20 : vector<1x8x32xf32> to vector<8x32xf32>
    %22 = vector.shape_cast %19 : vector<8x32xf32> to vector<1x8x32xf32>
    tpu.vector_store %arg9[%c0_18, %c0_19, %c0_20], %22 {strides = array<i32>} : memref<1x8x32xf32, #tpu.memory_space<vmem>>, vector<1x8x32xf32>,
    return
  }
  func.func @transform_0(%arg0: i32, %arg1: i32) -> (i32, i32, i32) {
    %c0_i32 = arith.constant 0 : i32
    %c0_i32_0 = arith.constant 0 : i32
    return %arg1, %arg0, %c0_i32 : i32, i32, i32
  }
  func.func @transform_1(%arg0: i32, %arg1: i32) -> (i32, i32) {
    %c0_i32 = arith.constant 0 : i32
    %c0_i32_0 = arith.constant 0 : i32
    return %arg0, %c0_i32 : i32, i32
  }
  func.func @transform_2(%arg0: i32, %arg1: i32) -> (i32, i32) {
    %c0_i32 = arith.constant 0 : i32
    %c0_i32_0 = arith.constant 0 : i32
    %c0_i32_1 = arith.constant 0 : i32
    return %c0_i32, %c0_i32_0 : i32, i32
  }
  func.func @transform_3(%arg0: i32, %arg1: i32) -> (i32, i32) {
    %c0_i32 = arith.constant 0 : i32
    %c0_i32_0 = arith.constant 0 : i32
    %c0_i32_1 = arith.constant 0 : i32
    return %c0_i32, %c0_i32_0 : i32, i32
  }
  func.func @transform_4(%arg0: i32, %arg1: i32) -> (i32, i32) {
    %c0_i32 = arith.constant 0 : i32
    %c0_i32_0 = arith.constant 0 : i32
    %c0_i32_1 = arith.constant 0 : i32
    return %c0_i32, %c0_i32_0 : i32, i32
  }
  func.func @transform_5(%arg0: i32, %arg1: i32) -> (i32, i32) {
    %c0_i32 = arith.constant 0 : i32
    %c0_i32_0 = arith.constant 0 : i32
    %c0_i32_1 = arith.constant 0 : i32
    return %c0_i32, %c0_i32_0 : i32, i32
  }
  func.func @transform_6(%arg0: i32, %arg1: i32) -> (i32, i32) {
    %c0_i32 = arith.constant 0 : i32
    %c0_i32_0 = arith.constant 0 : i32
    %c0_i32_1 = arith.constant 0 : i32
    return %c0_i32, %c0_i32_0 : i32, i32
  }
  func.func @transform_7(%arg0: i32, %arg1: i32) -> (i32, i32, i32) {
    %c0_i32 = arith.constant 0 : i32
    %c0_i32_0 = arith.constant 0 : i32
    return %arg1, %arg0, %c0_i32 : i32, i32, i32
  }
}

</mosaic_0001>

<bundles_post_ra>
// kernel: tpu_custom_call.1
= control target key start
LH: loop header
LB: loop body
LE: loop exit
PB: predicated region body
PF: predicated region fallthrough
CT: control target
= control target key end

     0   :  { %12 = vsyncpa [#allocation3], 0  ;;  %s911_s0 = inlined_call_operand.vmem [shape: f32[2,8,32], index: 0, kind: input, shape index: {}]   ;;  %s912_s1 = inlined_call_operand.vmem [shape: f32[8,64], index: 1, kind: input, shape index: {}]   ;;  %s913_s2 = inlined_call_operand.vmem [shape: f32[32,64], index: 2, kind: input, shape index: {}]   ;;  %s914_s3 = inlined_call_operand.vmem [shape: f32[64,128], index: 3, kind: input, shape index: {}]   ;;  %s915_s4 = inlined_call_operand.vmem [shape: f32[1,128], index: 4, kind: input, shape index: {}]   ;;  %s916_s5 = inlined_call_operand.vmem [shape: f32[128,32], index: 5, kind: input, shape index: {}]   ;;  %s917_s6 = inlined_call_operand.vmem [shape: f32[1,32], index: 6, kind: input, shape index: {}]   ;;  %s918_s7 = inlined_call_operand.hbm [shape: f32[2,8,32], index: 7, kind: output, shape index: {}]  }
   0x1   :  { %14 = vsyncpa [#allocation3 + $0x1], 0  ;;  %s719_s24 = smov 0   ;;  %s721_s25 = smov 0  }
   0x2   :  { %s723_s26 = smov 0   ;;  %s725_s27 = smov 0  }
   0x3   :  { %s727_s28 = smov 0   ;;  %s729_s29 = smov 0  }
   0x4 LB: > { %s528_s30 = sadd.s32 4294967295, %s677_s29   ;;  %s529_s8 = sadd.s32 4294967294, %s677_s29   ;;  %s677_s29 = sphi %s729_s29, %s20_s29   ;;  %s673_s28 = sphi %s727_s28, %s925_s28   ;;  %s669_s27 = sphi %s725_s27, %s924_s27   ;;  %s665_s26 = sphi %s723_s26, %s923_s26   ;;  %s661_s25 = sphi %s721_s25, %s922_s25   ;;  %s657_s24 = sphi %s719_s24, %s921_s24  }
   0x5   : > { %s29_s9 = sadd.s32 1, %s673_s28  ;;  %s200_s10 = sadd.s32 1, %s665_s26 }
   0x6   : > { %p30_p0 = scmp.ge.s32.totalorder %s29_s9, 2  ;;  %p210_p1 = scmp.ne.s32.totalorder %s665_s26, %s661_s25 }
   0x7   : > { %p211_p2 = scmp.eq.s32.totalorder %s528_s30, 1  ;;  %p216_p3 = scmp.ne.s32.totalorder %s661_s25, %s657_s24 }
   0x8   : > { %s927_s9 = smov (%p30_p0, %s29_s9), 0  ;;  %p217_p5 = scmp.eq.s32.totalorder %s529_s8, 1 }
   0x9   : > { %p759_p4 = por %p211_p2, %p210_p1  ;;  %s195_s12 = ssub.s32 %s673_s28, %s927_s9 }
   0xa   : > { %p533_p6 = scmp.ge.s32.totalorder %s677_s29, 1  ;;  %p198_p7 = scmp.eq.s32.totalorder %s195_s12, 0 }
   0xb   : > { %p766_p8 = por %p217_p5, %p216_p3  ;;  %p267_p9 = scmp.lt.s32.totalorder %s677_s29, 3 }
   0xc   : > { %s772_s14 = scalar_select %p198_p7, %s665_s26, %s200_s10  }
   0xd   : > { %p268_p10 = pnand %p533_p6, %p267_p9 }
   0xe   : > { %p305_p11 = scmp.lt.s32.totalorder (!%p268_p10), %s669_s27, 1  ;;  %s302_s15 = sand.u32 (!%p268_p10), 1, %s661_s25  }
   0xf   : > { %271 = sbr.rel (%p268_p10) target bundleno = 425 (0x1a9), region = 48  ;;  %s534_s16 = sshll.u32 (!%p268_p10), %s302_s15, 3 }
  0x10   : > { %s304_s23 = scalar_lea.vmem (!%p268_p10), [#allocation2], %s534_s16  ;;  %s426_s10 = scalar_lea.sflag (!%p268_p10), [#allocation3], %s302_s15 }
  0x11   : > { %s439_s30 = sshll.u32 (!%p268_p10), %s304_s23, 4  ;;  %s619_s16 = scalar_lea.hbm (!%p268_p10), %s918_s7, 16  ;;  %s440_s30 = int_to_ptr.vmem [resolvable:$true] %s439_s30 }
  0x14   : > { %v320_v0 = vld [vmem:[%s913_s2 + $0x18] sm:$0xff]  ;;  %v319_v1 = vld [vmem:[%s913_s2 + $0x10] sm:$0xff]  ;;  %v318_v4 = vld [vmem:[%s913_s2 + $0x8] sm:$0xff]  ;;  %s306_s8 = scalar_select %p305_p11, %s669_s27, 1  ;;  %vm322_vm0 = vcmask 261120   ;;  %vm359_vm1 = vcmask 523264  }
  0x15   : > { %338 = vmatpush.msra.mxu0 %v320_v0  ;;  %v354_v2 = vld [vmem:[%s914_s3 + $0x38] sm:$0xff]  ;;  %v353_v3 = vld [vmem:[%s914_s3 + $0x30] sm:$0xff]  ;;  %v352_v5 = vld [vmem:[%s914_s3 + $0x28] sm:$0xff] }
  0x16   : > { %371 = vmatpush.msra.mxu1 %v354_v2  ;;  %v317_v6 = vld [vmem:[%s913_s2] sm:$0xff]  ;;  %s535_s17 = sshll.u32 %s306_s8, 3  ;;  %v350_v9 = vld [vmem:[%s914_s3 + $0x18] sm:$0xff]  ;;  %v349_v10 = vld [vmem:[%s914_s3 + $0x10] sm:$0xff] }
  0x17   : > { %339 = vmatpush.msra.mxu0 %v319_v1  ;;  %s311_s20 = scalar_lea.vmem %s911_s0, %s535_s17  ;;  %v351_v7 = vld [vmem:[%s914_s3 + $0x20] sm:$0xff]  ;;  %v348_v11 = vld [vmem:[%s914_s3 + $0x8] sm:$0xff]  ;;  %v399_v13 = vld [vmem:[%s916_s5 + $0x78] sm:$0xff]  ;;  %s539_s17 = sshll.u32 %s669_s27, 3 }
  0x18   : > { %372 = vmatpush.msra.mxu1 %v353_v3  ;;  %v316_v8 = vld [vmem:[%s311_s20] sm:$0xff]  ;;  %v398_v14 = vld [vmem:[%s916_s5 + $0x70] sm:$0xff]  ;;  %404 = vmatpush.msra.mxu2 %v399_v13  ;;  %v397_v15 = vld [vmem:[%s916_s5 + $0x68] sm:$0xff]  ;;  %s437_s20 = scalar_lea.hbm %s918_s7, %s539_s17 }
  0x19   : > { %340 = vmatpush.msra.mxu0 %v318_v4  ;;  %v347_v12 = vld [vmem:[%s914_s3] sm:$0xff]  ;;  %v395_v17 = vld [vmem:[%s916_s5 + $0x58] sm:$0xff]  ;;  %v394_v18 = vld [vmem:[%s916_s5 + $0x50] sm:$0xff]  ;;  %s441_s8 = sshll.u32 %s437_s20, 4  ;;  %s442_s8 = int_to_ptr.hbm [resolvable:$true] %s441_s8 }
  0x1a   : > { %373 = vmatpush.msra.mxu1 %v352_v5  ;;  %405 = vmatpush.msra.mxu2 %v398_v14  ;;  %v396_v16 = vld [vmem:[%s916_s5 + $0x60] sm:$0xff]  ;;  %v393_v19 = vld [vmem:[%s916_s5 + $0x48] sm:$0xff]  ;;  %v391_v21 = vld [vmem:[%s916_s5 + $0x38] sm:$0xff]  ;;  %s613_s27 = sshra.s32 %s442_s8, 4  ;;  %s614_s27 = int_to_ptr.hbm [resolvable:$true] %s613_s27 }
  0x1b   : > { %341 = vmatpush.msra.mxu0 %v317_v6  ;;  %v392_v20 = vld [vmem:[%s916_s5 + $0x40] sm:$0xff]  ;;  %v390_v22 = vld [vmem:[%s916_s5 + $0x30] sm:$0xff]  ;;  %v389_v23 = vld [vmem:[%s916_s5 + $0x28] sm:$0xff]  ;;  %s615_s12 = scalar_lea.hbm %s614_s27, 8  ;;  %p620_p1 = scmp.lt.s32.totalorder %s614_s27, %s918_s7 }
  0x1c   : > { %536 = vmatmul.msk.f32.vlgmr.msra.gmra.mxu0 %vm322_vm0, %v316_v8  ;;  %374 = vmatpush.msra.mxu1 %v351_v7  ;;  %v388_v24 = vld [vmem:[%s916_s5 + $0x20] sm:$0xff]  ;;  %v387_v25 = vld [vmem:[%s916_s5 + $0x18] sm:$0xff]  ;;  %v386_v30 = vld [vmem:[%s916_s5 + $0x10] sm:$0xff]  ;;  %p616_p12 = scmp.ne.s32.totalorder %s614_s27, %s615_s12  ;;  %p621_p2 = scmp.lt.s32.totalorder %s619_s16, %s615_s12 }
  0x1d   : > { %406 = vmatpush.msra.mxu2 %v397_v15  ;;  %v321_v26 = vld [vmem:[%s912_s1] sm:$0xff]  ;;  %v385_v31 = vld [vmem:[%s916_s5 + $0x8] sm:$0xff] }
  0x1e   : > { %375 = vmatpush.msra.mxu1 %v350_v9  ;;  %v384_v32 = vld [vmem:[%s916_s5] sm:$0xff]  ;;  %p617_p13 = pnand %p616_p12, %p759_p4  ;;  %p622_p3 = por %p621_p2, %p620_p1 }
  0x1f   : > { %407 = vmatpush.msra.mxu2 %v396_v16  ;;  %v597_v33 = vld [vmem:[%s915_s4] ss:$0 sm:$0xff] }
  0x20   : > { %376 = vmatpush.msra.mxu1 %v349_v10  ;;  %v598_v37 = vld [vmem:[%s917_s6] ss:$0 sm:$0xff]  ;;  %p618_p0 = pneg %p617_p13 }
  0x21   : > { %408 = vmatpush.msra.mxu2 %v395_v17 }
  0x22   : > { %377 = vmatpush.msra.mxu1 %v348_v11  ;;  %p623_p5 = pnand %p622_p3, %p618_p0 }
  0x23   : > { %409 = vmatpush.msra.mxu2 %v394_v18 }
  0x24   : > { %378 = vmatpush.msra.mxu1 %v347_v12 }
  0x25   : > { %410 = vmatpush.msra.mxu2 %v393_v19 }
  0x27   : > { %411 = vmatpush.msra.mxu2 %v392_v20 }
  0x29   : > { %412 = vmatpush.msra.mxu2 %v391_v21 }
  0x2b   : > { %413 = vmatpush.msra.mxu2 %v390_v22 }
  0x2d   : > { %414 = vmatpush.msra.mxu2 %v389_v23 }
  0x2f   : > { %415 = vmatpush.msra.mxu2 %v388_v24 }
  0x31   : > { %416 = vmatpush.msra.mxu2 %v387_v25 }
  0x33   : > { %417 = vmatpush.msra.mxu2 %v386_v30 }
  0x35   : > { %418 = vmatpush.msra.mxu2 %v385_v31 }
  0x37   : > { %419 = vmatpush.msra.mxu2 %v384_v32 }
  0x99   : > { %v343_v27 = vpop.f32.mrf.mxu0 }
  0x9a   : > { %v344_v28 = vadd.f32 %v343_v27, %v321_v26 }
  0x9c   : > { %v346_v29 = vmax.f32 %v344_v28, 0.0 }
  0x9e   : > { %537 = vmatmul.msk.f32.vlgmr.msra.gmra.mxu1 %vm359_vm1, %v346_v29 }
 0x11b   : > { %v380_v34 = vpop.f32.mrf.mxu1 }
 0x11c   : > { %v381_v35 = vadd.f32 %v597_v33, %v380_v34 }
 0x11e   : > { %v383_v36 = vmax.f32 %v381_v35, 0.0 }
 0x120   : > { %420 = vmatmul.f32.vlgmr.msra.gmra.mxu2 %v383_v36 }
 0x1a3   : > { %v421_v38 = vpop.f32.mrf.mxu2 }
 0x1a4   : > { %v422_v39 = vadd.f32 %v598_v37, %v421_v38 }
 0x1a6   : > { %424 = vst.msk [vmem:[%s304_s23] sm:$0xff] %vm322_vm0, %v422_v39 }
 0x1a7   : > { %626 = shalt.err (!%p623_p5)
}
 0x1a8   : > { %542 = dma.vmem_to_hbm [thread:$0]  (%p759_p4), %s440_s30, 128, %s442_s8, %s426_s10  }
 0x1a9 PF: > { %p548_p6 = scmp.ge.s32.totalorder %s677_s29, 2  ;;  %s453_s15 = sand.u32 1, %s657_s24  }
 0x1aa   : > { %s454_s21 = scalar_lea.sflag [#allocation3], %s453_s15 }
 0x1ab   : > { %p545_p7 = pnand %p548_p6, %p766_p8 }
 0x1ad   : > { %p546_p9 = pneg %p545_p7 }
 0x1af   : > { %652 = dma.done.wait (%p546_p9), %s454_s21, 128  }
 0x1b0   : > { %654 = vsyncadd (%p546_p9), %s454_s21, 4294967168  ;;  %s20_s29 = sadd.s32 1, %s677_s29   ;;  %s921_s24 = smov %s661_s25 }
 0x1b1   : > { %p17_p10 = scmp.ge.s32.totalorder %s20_s29, 4   ;;  %s922_s25 = smov %s665_s26 }
 0x1b2   : > { %s923_s26 = smov %s772_s14  ;;  %s924_s27 = smov %s673_s28 }
 0x1b3   : > { %s925_s28 = smov %s927_s9  ;;  %19 = sbr.rel (!%p17_p10) target bundleno = 4 (0x4), region = 86 }
 0x1b8   :  { %460 = vsyncpa [#allocation3], 1 }
 0x1b9   :  { %462 = vsyncpa [#allocation3 + $0x1], 1 }

</bundles_post_ra>
